<compile_context>
chip_gen: v5e
topology: v5e:2x2
jax: 0.10.0
libtpu: 0.0.40
codegen_flags: <defaults>
</compile_context>

<pallas_src>
import functools

import numpy as np
import jax
import jax.numpy as jnp
from jax.experimental import pallas as pl
from jax.experimental.pallas import tpu as pltpu

PAD_LENGTH = 5        # hard-coded in the PyTorch module for padding_mode='median'
_LANE = 128
_SUBLANE = 8
_FUSE_MAX_W = 256     # fuse S@T into a single matmul when the row width is <= this


def _round_up(n, m):
    return ((n + m - 1) // m) * m


# --------------------------------------------------------------------------- #
# Kernel
# --------------------------------------------------------------------------- #
def _decomp_kernel(kernel_size, fused, x_ref, meds_ref, fe_ref, *rest):
    if fused:
        m_ref, resid_ref, trend_ref, seas_ref = rest
    else:
        s_ref, t_ref, resid_ref, trend_ref, seas_ref = rest

    x = x_ref[...].astype(jnp.float32)        # (TILE_R, W); lanes outside each
    W = x.shape[-1]                           # series' [0, L) window are zero.
    pad = (kernel_size - 1) // 2

    # Moving *sum* of the window via XLU lane rolls.  Every series slot carries
    # >= pad trailing zero lanes, so roll wrap-around / cross-slot reads only
    # ever pull zeros into valid output lanes -> no compares / selects needed.
    acc = x
    for o in range(1, pad + 1):
        acc = acc + pltpu.roll(x, o, axis=1) + pltpu.roll(x, W - o, axis=1)

    # One-shot edge correction: median 'pad' contributions of the window.  The
    # relu(pad-u)/relu(u-(L-1-pad)) lane weights are folded into FE on the host,
    # so the correction is a single tiny MXU matmul (zero VPU work).
    edge = jnp.dot(meds_ref[...], fe_ref[...], preferred_element_type=jnp.float32)

    trend = (acc + edge) * (1.0 / kernel_size)
    res = x - trend

    # Seasonal component on the (otherwise idle) MXU.
    if fused:
        seas = jnp.dot(res, m_ref[...], preferred_element_type=jnp.float32)
    else:
        seasonal = jnp.dot(res, s_ref[...], preferred_element_type=jnp.float32)
        seas = jnp.dot(seasonal, t_ref[...], preferred_element_type=jnp.float32)

    # Lanes outside each series' [0, L) window hold garbage; they are cropped
    # by the wrapper before anything reads them.
    trend_ref[...] = trend.astype(trend_ref.dtype)
    seas_ref[...] = seas.astype(seas_ref.dtype)
    resid_ref[...] = (res - seas).astype(resid_ref.dtype)


# --------------------------------------------------------------------------- #
# Host-built constant matrices
# --------------------------------------------------------------------------- #
def _build_edge_matrix(L, L_slot, G, W, pad, k_pad):
    """FE: (k_pad, W); rows [front_med of slot 0..G-1 | end_med of slot 0..G-1 | 0].

    (meds @ FE)[row, g*L_slot + u] = relu(pad - u) * front_med_g
                                   + relu(u - (L - 1 - pad)) * end_med_g
    """
    t = np.arange(W)
    u = t % L_slot
    g = np.minimum(t // L_slot, G - 1)
    valid = (t < G * L_slot) & (u < L)
    fw = np.where(valid, np.maximum(0, pad - u), 0).astype(np.float32)
    ew = np.where(valid, np.maximum(0, u - (L - 1 - pad)), 0).astype(np.float32)
    fe = np.zeros((k_pad, W), np.float32)
    fe[g, t] = fw
    fe[G + g, t] = ew
    return fe


def _seasonal_block(L, L_slot, P):
    """Per-series fused seasonal matrix (L_slot, L_slot): seas_row = res_row @ blk.

    Matches torch: if L % P != 0, res[..., L-P : L-(L%P)] is appended once more,
    so phases >= L%P count source L-P+phase-(L%P) twice; n_cycles = L//P + 1.
    """
    pad_len = L % P
    n_cycles = L // P + (1 if pad_len > 0 else 0)
    m = np.zeros((L_slot, L_slot), np.float32)
    src = np.arange(L)
    for dst in range(L):
        ph = dst % P
        w = (src % P == ph).astype(np.float32)
        if pad_len > 0 and ph >= pad_len:
            w[L - P + ph - pad_len] += 1.0
        m[:L, dst] = w / n_cycles
    return m


def _build_seasonal_fused(L, L_slot, G, W, P):
    blk = _seasonal_block(L, L_slot, P)
    m = np.zeros((W, W), np.float32)
    for g in range(G):
        s = g * L_slot
        m[s:s + L_slot, s:s + L_slot] = blk
    return m


def _build_seasonal_factored(L, W, P):
    """S: (W, P) phase-mean matrix; T: (P, W) phase-tiling matrix (unpacked only)."""
    pad_len = L % P
    n_cycles = L // P + (1 if pad_len > 0 else 0)
    t = np.arange(W)[:, None]
    i = np.arange(P)[None, :]
    valid = t < L
    phase = (t % P == i) & valid
    if pad_len > 0:
        dup = (i >= pad_len) & (t == (L - P + i - pad_len))
    else:
        dup = np.zeros_like(phase)
    S = (phase.astype(np.float32) + dup.astype(np.float32)) / n_cycles
    T = phase.astype(np.float32).T
    return S, T


def _vmem_capacity_bytes():
    try:
        info = pltpu.get_tpu_info()
        for attr in ("vmem_capacity_bytes", "vmem_size_bytes", "vmem_bytes"):
            v = getattr(info, attr, None)
            if v:
                return int(v)
    except Exception:
        pass
    return 64 * 1024 * 1024  # conservative fallback (v7x per-TC VMEM)


# --------------------------------------------------------------------------- #
# Wrapper
# --------------------------------------------------------------------------- #
def trend_seasonality_decomposition(x, kernel_size, periodicity):
    """x: (B, C, L).  Returns (out_residual, out_trend, out_seasonal), each (B, C, L)."""
    if kernel_size % 2 != 1:
        raise ValueError("kernel_size must be odd (matches the PyTorch module)")
    B, C, L = x.shape
    if L < PAD_LENGTH:
        raise ValueError(f"series length L={L} must be >= {PAD_LENGTH} for 'median' padding")
    if L < periodicity:
        raise ValueError(f"series length L={L} must be >= periodicity={periodicity}")

    dtype = x.dtype
    pad = (kernel_size - 1) // 2
    P = periodicity
    R = B * C

    # ---- lane layout: pack several short series per 128-lane row --------------
    # Each series occupies a slot of L_slot >= L + pad lanes, so the moving-sum
    # rolls never pull a neighbouring series (or wrap-around) into valid lanes.
    slot_min = L + pad
    G = max(1, _LANE // slot_min)            # series packed per row
    if G >= 2:
        L_slot = _LANE // G
        W = _LANE
    else:
        G = 1
        L_slot = W = _round_up(slot_min, _LANE)
    assert pad < W and L_slot >= L + pad

    Rg = _round_up(R, G)                     # series count padded to a multiple of G
    Rp = Rg // G                             # packed row count
    fused = W <= _FUSE_MAX_W
    k_pad = _round_up(2 * G, _SUBLANE)       # padded K for the edge-correction matmul

    # ---- VMEM-derived row tile (conservative: query may be per-chip on v7x) ---
    reported = _vmem_capacity_bytes()
    vmem_cap = min(reported, 128 << 20)
    tile_cap = 1024 if vmem_cap >= (96 << 20) else 512     # bigger blocks on v5e/v6e
    itemsize = jnp.dtype(dtype).itemsize
    matrix_bytes = (W * W * 4) if fused else (2 * W * P * 4)
    blk_bytes = (8 * itemsize + 40) * W + 16 * k_pad       # 2x-buffered I/O + f32 temps / row
    budget = int(0.35 * vmem_cap) - matrix_bytes - (1 << 20)
    tile_r = max(_SUBLANE,
                 min(tile_cap, max(0, budget) // blk_bytes // _SUBLANE * _SUBLANE))
    # guarantee several grid steps (pipeline overlap + both v7x TensorCores busy)
    rows_aligned = _round_up(Rp, _SUBLANE)
    quarter = max(_SUBLANE, (rows_aligned // 4) // _SUBLANE * _SUBLANE)
    tile_r = min(tile_r, quarter)
    R_pad = _round_up(Rp, tile_r)

    # ---- host-side prep (tiny): pack x, medians of first/last 5 steps ---------
    x_flat = x.reshape(R, L)
    x_g = jnp.pad(x_flat, ((0, Rg - R), (0, L_slot - L)))          # per-series zero tail
    x2 = x_g.reshape(Rp, G * L_slot)
    x2 = jnp.pad(x2, ((0, R_pad - Rp), (0, W - G * L_slot)))

    xf = x_flat.astype(jnp.float32)
    front_med = jnp.median(xf[:, :PAD_LENGTH], axis=1)             # exact: odd count
    end_med = jnp.median(xf[:, L - PAD_LENGTH:], axis=1)
    fm = jnp.pad(front_med, (0, Rg - R)).reshape(Rp, G)
    em = jnp.pad(end_med, (0, Rg - R)).reshape(Rp, G)
    meds = jnp.concatenate(
        [fm, em, jnp.zeros((Rp, k_pad - 2 * G), jnp.float32)], axis=1)
    meds = jnp.pad(meds, ((0, R_pad - Rp), (0, 0)))

    fe = jnp.asarray(_build_edge_matrix(L, L_slot, G, W, pad, k_pad))
    if fused:
        mats = (jnp.asarray(_build_seasonal_fused(L, L_slot, G, W, P)),)
        mat_specs = [pl.BlockSpec((W, W), lambda i: (0, 0))]
    else:
        S, T = _build_seasonal_factored(L, W, P)
        mats = (jnp.asarray(S), jnp.asarray(T))
        mat_specs = [pl.BlockSpec((W, P), lambda i: (0, 0)),
                     pl.BlockSpec((P, W), lambda i: (0, 0))]

    est = tile_r * blk_bytes + matrix_bytes + (2 << 20)
    # keep the scoped limit within the most conservative per-TC capacity (v7x 64 MiB)
    vmem_limit = int(min(56 << 20, max(32 << 20, int(1.4 * est))))

    row_spec = pl.BlockSpec((tile_r, W), lambda i: (i, 0))
    med_spec = pl.BlockSpec((tile_r, k_pad), lambda i: (i, 0))
    fe_spec = pl.BlockSpec((k_pad, W), lambda i: (0, 0))

    kern = functools.partial(_decomp_kernel, kernel_size, fused)
    resid, trend, seas = pl.pallas_call(
        kern,
        out_shape=tuple(jax.ShapeDtypeStruct((R_pad, W), dtype) for _ in range(3)),
        grid=(R_pad // tile_r,),
        in_specs=[row_spec, med_spec, fe_spec] + mat_specs,
        out_specs=(row_spec,) * 3,
        compiler_params=pltpu.CompilerParams(
            dimension_semantics=("parallel",),      # shard rows across v7x TCs
            vmem_limit_bytes=vmem_limit),
    )(x2, meds, fe, *mats)

    def crop(a):
        a = a[:Rp, :G * L_slot].reshape(Rg, L_slot)
        return a[:R, :L].reshape(B, C, L)

    return crop(resid), crop(trend), crop(seas)


# ---------------- pure-JAX reference (for correctness check only) ----------------
def _reference(x, kernel_size, periodicity):
    pad = (kernel_size - 1) // 2
    L = x.shape[-1]
    front = jnp.repeat(jnp.median(x[:, :, :PAD_LENGTH], axis=2, keepdims=True), pad, axis=2)
    end = jnp.repeat(jnp.median(x[:, :, -PAD_LENGTH:], axis=2, keepdims=True), pad, axis=2)
    xp = jnp.concatenate([front, x, end], axis=2)
    trend = jnp.stack([xp[:, :, j:j + kernel_size].mean(axis=-1) for j in range(L)], axis=-1)
    res = x - trend
    P = periodicity
    pad_len = L % P
    xs = jnp.concatenate([res, res[:, :, -P:-pad_len]], axis=-1) if pad_len > 0 else res
    out_seas = jnp.zeros_like(res)
    out_resid = jnp.zeros_like(res)
    for i in range(P):
        seasonal = jnp.mean(xs[:, :, i::P], axis=2, keepdims=True)
        out_seas = out_seas.at[:, :, i::P].set(seasonal)
        out_resid = out_resid.at[:, :, i::P].set(res[:, :, i::P] - seasonal)
    return out_resid, trend, out_seas


if __name__ == "__main__":
    key = jax.random.PRNGKey(0)
    configs = [
        ((2, 4, 16), 5, 5),      # short series -> packed (7 series / 128-lane row), fused S@T
        ((2, 3, 200), 25, 24),   # unpacked row (W=256), fused S@T
        ((1, 2, 300), 7, 7),     # unpacked wide row (W=384), factored S / T
    ]
    for n, (shape, ks, per) in enumerate(configs):
        key, sub = jax.random.split(key)
        x = jax.random.normal(sub, shape, dtype=jnp.float32)
        out = trend_seasonality_decomposition(x, ks, per)
        jax.block_until_ready(out)
        ref = _reference(x, ks, per)
        for got, want in zip(out, ref):
            assert got.shape == want.shape and got.dtype == want.dtype
            assert jnp.allclose(got, want, atol=3e-5, rtol=3e-5), f"mismatch vs reference (config {n})"
    print("KERNEL_OK")
</pallas_src>

<mosaic_0001>
module attributes {stable_mosaic.version = 11 : i64} {
  func.func @_decomp_kernel(%arg0: i32, %arg1: memref<8x128xf32, #tpu.memory_space<vmem>>, %arg2: memref<8x16xf32, #tpu.memory_space<vmem>>, %arg3: memref<16x128xf32, #tpu.memory_space<vmem>>, %arg4: memref<128x128xf32, #tpu.memory_space<vmem>>, %arg5: memref<8x128xf32, #tpu.memory_space<vmem>>, %arg6: memref<8x128xf32, #tpu.memory_space<vmem>>, %arg7: memref<8x128xf32, #tpu.memory_space<vmem>>) attributes {dimension_semantics = [#tpu.dimension_semantics<parallel>], iteration_bounds = array<i64: 1>, scalar_prefetch = 0 : i64, scratch_operands = 0 : i64, tpu.core_type = #tpu.core_type<tc>, window_params = [{transform_indices = @transform_0, window_bounds = array<i64: 8, 128>}, {transform_indices = @transform_1, window_bounds = array<i64: 8, 16>}, {pipeline_mode = #tpu.pipeline_mode<synchronous>, transform_indices = @transform_2, window_bounds = array<i64: 16, 128>}, {pipeline_mode = #tpu.pipeline_mode<synchronous>, transform_indices = @transform_3, window_bounds = array<i64: 128, 128>}, {transform_indices = @transform_4, window_bounds = array<i64: 8, 128>}, {transform_indices = @transform_5, window_bounds = array<i64: 8, 128>}, {transform_indices = @transform_6, window_bounds = array<i64: 8, 128>}]} {
    %c0 = arith.constant 0 : index
    %c0_0 = arith.constant 0 : index
    %0 = vector.load %arg1[%c0, %c0_0] : memref<8x128xf32, #tpu.memory_space<vmem>>, vector<8x128xf32>
    %c1_i32 = arith.constant 1 : i32
    %1 = tpu.dynamic_rotate %0 by %c1_i32 dim 1 : vector<8x128xf32>, i32 -> vector<8x128xf32>
    %2 = arith.addf %0, %1 : vector<8x128xf32>
    %c127_i32 = arith.constant 127 : i32
    %3 = tpu.dynamic_rotate %0 by %c127_i32 dim 1 : vector<8x128xf32>, i32 -> vector<8x128xf32>
    %4 = arith.addf %2, %3 : vector<8x128xf32>
    %c2_i32 = arith.constant 2 : i32
    %5 = tpu.dynamic_rotate %0 by %c2_i32 dim 1 : vector<8x128xf32>, i32 -> vector<8x128xf32>
    %6 = arith.addf %4, %5 : vector<8x128xf32>
    %c126_i32 = arith.constant 126 : i32
    %7 = tpu.dynamic_rotate %0 by %c126_i32 dim 1 : vector<8x128xf32>, i32 -> vector<8x128xf32>
    %8 = arith.addf %6, %7 : vector<8x128xf32>
    %c0_1 = arith.constant 0 : index
    %c0_2 = arith.constant 0 : index
    %9 = vector.load %arg2[%c0_1, %c0_2] : memref<8x16xf32, #tpu.memory_space<vmem>>, vector<8x16xf32>
    %c0_3 = arith.constant 0 : index
    %c0_4 = arith.constant 0 : index
    %10 = vector.load %arg3[%c0_3, %c0_4] : memref<16x128xf32, #tpu.memory_space<vmem>>, vector<16x128xf32>
    %cst = arith.constant dense<0.000000e+00> : vector<8x128xf32>
    %11 = tpu.matmul %9, %10, %cst {dimension_numbers = #tpu.dot_dimension_numbers<[1], [0], [0], [1], [0, 0, 1, 1], [], []>} : vector<8x16xf32>, vector<16x128xf32>, vector<8x128xf32> -> vector<8x128xf32>
    %12 = arith.addf %8, %11 : vector<8x128xf32>
    %cst_5 = arith.constant 2.000000e-01 : f32
    %13 = vector.broadcast %cst_5 : f32 to vector<8x128xf32>
    %14 = arith.mulf %12, %13 : vector<8x128xf32>
    %15 = arith.subf %0, %14 : vector<8x128xf32>
    %c0_6 = arith.constant 0 : index
    %c0_7 = arith.constant 0 : index
    %16 = vector.load %arg4[%c0_6, %c0_7] : memref<128x128xf32, #tpu.memory_space<vmem>>, vector<128x128xf32>
    %cst_8 = arith.constant dense<0.000000e+00> : vector<8x128xf32>
    %17 = tpu.matmul %15, %16, %cst_8 {dimension_numbers = #tpu.dot_dimension_numbers<[1], [0], [0], [1], [0, 0, 1, 1], [], []>} : vector<8x128xf32>, vector<128x128xf32>, vector<8x128xf32> -> vector<8x128xf32>
    %c0_9 = arith.constant 0 : index
    %c0_10 = arith.constant 0 : index
    %18 = vector.load %arg6[%c0_9, %c0_10] : memref<8x128xf32, #tpu.memory_space<vmem>>, vector<8x128xf32>
    tpu.vector_store %arg6[%c0_9, %c0_10], %14 {strides = array<i32>} : memref<8x128xf32, #tpu.memory_space<vmem>>, vector<8x128xf32>,
    %c0_11 = arith.constant 0 : index
    %c0_12 = arith.constant 0 : index
    %19 = vector.load %arg7[%c0_11, %c0_12] : memref<8x128xf32, #tpu.memory_space<vmem>>, vector<8x128xf32>
    tpu.vector_store %arg7[%c0_11, %c0_12], %17 {strides = array<i32>} : memref<8x128xf32, #tpu.memory_space<vmem>>, vector<8x128xf32>,
    %20 = arith.subf %15, %17 : vector<8x128xf32>
    %c0_13 = arith.constant 0 : index
    %c0_14 = arith.constant 0 : index
    %21 = vector.load %arg5[%c0_13, %c0_14] : memref<8x128xf32, #tpu.memory_space<vmem>>, vector<8x128xf32>
    tpu.vector_store %arg5[%c0_13, %c0_14], %20 {strides = array<i32>} : memref<8x128xf32, #tpu.memory_space<vmem>>, vector<8x128xf32>,
    return
  }
  func.func @transform_0(%arg0: i32) -> (i32, i32) {
    %c0_i32 = arith.constant 0 : i32
    %c0_i32_0 = arith.constant 0 : i32
    return %arg0, %c0_i32 : i32, i32
  }
  func.func @transform_1(%arg0: i32) -> (i32, i32) {
    %c0_i32 = arith.constant 0 : i32
    %c0_i32_0 = arith.constant 0 : i32
    return %arg0, %c0_i32 : i32, i32
  }
  func.func @transform_2(%arg0: i32) -> (i32, i32) {
    %c0_i32 = arith.constant 0 : i32
    %c0_i32_0 = arith.constant 0 : i32
    %c0_i32_1 = arith.constant 0 : i32
    return %c0_i32, %c0_i32_0 : i32, i32
  }
  func.func @transform_3(%arg0: i32) -> (i32, i32) {
    %c0_i32 = arith.constant 0 : i32
    %c0_i32_0 = arith.constant 0 : i32
    %c0_i32_1 = arith.constant 0 : i32
    return %c0_i32, %c0_i32_0 : i32, i32
  }
  func.func @transform_4(%arg0: i32) -> (i32, i32) {
    %c0_i32 = arith.constant 0 : i32
    %c0_i32_0 = arith.constant 0 : i32
    return %arg0, %c0_i32 : i32, i32
  }
  func.func @transform_5(%arg0: i32) -> (i32, i32) {
    %c0_i32 = arith.constant 0 : i32
    %c0_i32_0 = arith.constant 0 : i32
    return %arg0, %c0_i32 : i32, i32
  }
  func.func @transform_6(%arg0: i32) -> (i32, i32) {
    %c0_i32 = arith.constant 0 : i32
    %c0_i32_0 = arith.constant 0 : i32
    return %arg0, %c0_i32 : i32, i32
  }
}

</mosaic_0001>

<bundles_post_ra>
// kernel: tpu_custom_call.1
= control target key start
LH: loop header
LB: loop body
LE: loop exit
PB: predicated region body
PF: predicated region fallthrough
CT: control target
= control target key end

     0   :  { %12 = vsyncpa [#allocation3], 0  ;;  %s475_s0 = inlined_call_operand.hbm [shape: f32[8,128], index: 0, kind: input, shape index: {}]   ;;  %s476_s1 = inlined_call_operand.hbm [shape: f32[8,16], index: 1, kind: input, shape index: {}]   ;;  %s477_s2 = inlined_call_operand.hbm [shape: f32[16,128], index: 2, kind: input, shape index: {}]   ;;  %s478_s3 = inlined_call_operand.hbm [shape: f32[128,128], index: 3, kind: input, shape index: {}]   ;;  %s479_s4 = inlined_call_operand.hbm [shape: f32[8,128], index: 4, kind: output, shape index: {0}]   ;;  %s480_s5 = inlined_call_operand.hbm [shape: f32[8,128], index: 5, kind: output, shape index: {1}]   ;;  %s481_s6 = inlined_call_operand.hbm [shape: f32[8,128], index: 6, kind: output, shape index: {2}]  }
   0x1   :  { %13 = vsyncpa [#allocation6], 0 }
   0x2   :  { %14 = vsyncpa [#allocation9], 0 }
   0x3   :  { %15 = vsyncpa [#allocation4], 0  ;;  %s33_s23 = sshll.u32 %s476_s1, 4  ;;  %s34_s23 = int_to_ptr.hbm [resolvable:$true] %s33_s23 }
   0x4   :  { %16 = vsyncpa [#allocation12], 0  ;;  %s406_s24 = smov [#allocation5]   ;;  %s22_s28 = sshll.u32 %s475_s0, 4  ;;  %s23_s28 = int_to_ptr.hbm [resolvable:$true] %s22_s28 }
   0x5   :  { %s35_s25 = sshll.u32 %s406_s24, 4  ;;  %s407_s29 = smov [#allocation2]   ;;  %s36_s25 = int_to_ptr.vmem [resolvable:$true] %s35_s25 }
   0x6   :  { %38 = dma.hbm_to_vmem [thread:$0]  %s34_s23, 128, %s36_s25, [#allocation6]  }
   0x7   :  { %s24_s30 = sshll.u32 %s407_s29, 4  ;;  %s43_s9 = sshll.u32 %s477_s2, 4  ;;  %s25_s30 = int_to_ptr.vmem [resolvable:$true] %s24_s30  ;;  %s44_s9 = int_to_ptr.hbm [resolvable:$true] %s43_s9 }
   0x8   :  { %27 = dma.hbm_to_vmem [thread:$0]  %s23_s28, 128, %s25_s30, [#allocation3]  }
   0x9   :  { %s408_s1 = smov [#allocation7]   ;;  %s56_s13 = sshll.u32 %s478_s3, 4  ;;  %s57_s13 = int_to_ptr.hbm [resolvable:$true] %s56_s13 }
   0xa   :  { %s45_s10 = sshll.u32 %s408_s1, 4  ;;  %s409_s14 = smov 128   ;;  %s46_s10 = int_to_ptr.vmem [resolvable:$true] %s45_s10 }
   0xb   :  { %s410_s0 = smov 8   ;;  %s411_s15 = smov [#allocation8]  }
   0xc   :  { %51 = dma.hbm_to_vmem [thread:$0]  %s44_s9, 256, %s46_s10, [#allocation6], %s409_s14, %s409_s14, %s410_s0  }
   0xd   :  { %s58_s16 = sshll.u32 %s411_s15, 4  ;;  %s59_s16 = int_to_ptr.vmem [resolvable:$true] %s58_s16 }
   0xe   :  { %64 = dma.hbm_to_vmem [thread:$0]  %s57_s13, 2048, %s59_s16, [#allocation9], %s409_s14, %s409_s14, %s410_s0  }
   0xf   :  { %396 = dma.done.wait [#allocation3], 128  }
  0x10   :  { %397 = vsyncadd [#allocation3], 4294967168 }
  0x11   :  { %398 = dma.done.wait [#allocation6], 384  }
  0x12   :  { %399 = vsyncadd [#allocation6], 4294966912 }
  0x13   :  { %400 = dma.done.wait [#allocation9], 2048  }
  0x14   :  { %401 = vsyncadd [#allocation9], 4294965248  ;;  %v96_v0 = vld [vmem:[#allocation7 + $0x8] sm:$0xff]  ;;  %v81_v1 = vld [vmem:[#allocation2] sm:$0xff]  ;;  %s412_s2 = smov 1   ;;  %vm97_vm0 = vcmask 130048  }
  0x15   :  { %v95_v2 = vld [vmem:[#allocation7] sm:$0xff]  ;;  %115 = vmatpush.msra.mxu0 %v96_v0  ;;  %82 = vrot.lane.b32.xlu0 %v81_v1, %s412_s2  ;;  %v94_v3 = vld [vmem:[#allocation5] sm:$0xff]  ;;  %v139_v4 = vld [vmem:[#allocation8 + $0x78] sm:$0xff]  ;;  %s413_s3 = smov 2   ;;  %s414_s17 = smov 127  }
  0x16   :  { %v138_v5 = vld [vmem:[#allocation8 + $0x70] sm:$0xff]  ;;  %88 = vrot.lane.b32.xlu1 %v81_v1, %s413_s3  ;;  %140 = vmatpush.msra.mxu1 %v139_v4  ;;  %v137_v6 = vld [vmem:[#allocation8 + $0x68] sm:$0xff]  ;;  %v136_v7 = vld [vmem:[#allocation8 + $0x60] sm:$0xff]  ;;  %s415_s18 = smov 126   ;;  %s416_s19 = smov [#allocation11]  }
  0x17   :  { %116 = vmatpush.msra.mxu0 %v95_v2  ;;  %v135_v8 = vld [vmem:[#allocation8 + $0x58] sm:$0xff]  ;;  %v134_v9 = vld [vmem:[#allocation8 + $0x50] sm:$0xff]  ;;  %v133_v10 = vld [vmem:[#allocation8 + $0x48] sm:$0xff]  ;;  %s180_s20 = sshll.u32 %s416_s19, 4  ;;  %s182_s23 = sshll.u32 %s480_s5, 4  ;;  %s181_s20 = int_to_ptr.vmem [resolvable:$true] %s180_s20  ;;  %s183_s23 = int_to_ptr.hbm [resolvable:$true] %s182_s23 }
  0x18   :  { %214 = vmatmul.msk.f32.vlgmr.msra.gmra.mxu0 %vm97_vm0, %v94_v3  ;;  %141 = vmatpush.msra.mxu1 %v138_v5  ;;  %v132_v11 = vld [vmem:[#allocation8 + $0x40] sm:$0xff]  ;;  %v131_v12 = vld [vmem:[#allocation8 + $0x38] sm:$0xff]  ;;  %v130_v13 = vld [vmem:[#allocation8 + $0x30] sm:$0xff]  ;;  %s417_s24 = smov [#allocation13]   ;;  %s193_s28 = sshll.u32 %s481_s6, 4  ;;  %s194_s28 = int_to_ptr.hbm [resolvable:$true] %s193_s28 }
  0x19   :  { %v129_v14 = vld [vmem:[#allocation8 + $0x28] sm:$0xff]  ;;  %v128_v15 = vld [vmem:[#allocation8 + $0x20] sm:$0xff]  ;;  %v127_v16 = vld [vmem:[#allocation8 + $0x18] sm:$0xff]  ;;  %s191_s25 = sshll.u32 %s417_s24, 4  ;;  %s418_s29 = smov [#allocation10]   ;;  %s192_s25 = int_to_ptr.vmem [resolvable:$true] %s191_s25 }
  0x1a   :  { %142 = vmatpush.msra.mxu1 %v137_v6  ;;  %v126_v17 = vld [vmem:[#allocation8 + $0x10] sm:$0xff]  ;;  %v125_v18 = vld [vmem:[#allocation8 + $0x8] sm:$0xff]  ;;  %v124_v19 = vld [vmem:[#allocation8] sm:$0xff]  ;;  %s169_s30 = sshll.u32 %s418_s29, 4  ;;  %s171_s9 = sshll.u32 %s479_s4, 4  ;;  %s170_s30 = int_to_ptr.vmem [resolvable:$true] %s169_s30  ;;  %s172_s9 = int_to_ptr.hbm [resolvable:$true] %s171_s9 }
  0x1c   :  { %143 = vmatpush.msra.mxu1 %v136_v7 }
  0x1d   :  { %85 = vrot.lane.b32.xlu0 %v81_v1, %s414_s17 }
  0x1e   :  { %91 = vrot.lane.b32.xlu1 %v81_v1, %s415_s18  ;;  %144 = vmatpush.msra.mxu1 %v135_v8 }
  0x20   :  { %145 = vmatpush.msra.mxu1 %v134_v9 }
  0x22   :  { %146 = vmatpush.msra.mxu1 %v133_v10 }
  0x24   :  { %147 = vmatpush.msra.mxu1 %v132_v11 }
  0x26   :  { %148 = vmatpush.msra.mxu1 %v131_v12 }
  0x28   :  { %149 = vmatpush.msra.mxu1 %v130_v13 }
  0x2a   :  { %150 = vmatpush.msra.mxu1 %v129_v14 }
  0x2c   :  { %151 = vmatpush.msra.mxu1 %v128_v15 }
  0x2e   :  { %152 = vmatpush.msra.mxu1 %v127_v16 }
  0x30   :  { %153 = vmatpush.msra.mxu1 %v126_v17 }
  0x32   :  { %154 = vmatpush.msra.mxu1 %v125_v18 }
  0x34   :  { %155 = vmatpush.msra.mxu1 %v124_v19 }
  0x87   :  { %v83_v20 = vpop.permute.xlu0 %82 }
  0x88   :  { %v89_v21 = vpop.permute.xlu1 %88  ;;  %v84_v22 = vadd.f32 %v83_v20, %v81_v1 }
  0x8f   :  { %v86_v23 = vpop.permute.xlu0 %85 }
  0x90   :  { %v87_v24 = vadd.f32 %v86_v23, %v84_v22  ;;  %v92_v25 = vpop.permute.xlu1 %91 }
  0x92   :  { %v90_v26 = vadd.f32 %v89_v21, %v87_v24 }
  0x94   :  { %v93_v27 = vadd.f32 %v92_v25, %v90_v26 }
  0x95   :  { %v118_v28 = vpop.f32.mrf.mxu0 }
  0x96   :  { %v121_v29 = vadd.f32 %v118_v28, %v93_v27 }
  0x98   :  { %v122_v30 = vmul.f32 0.2, %v121_v29 }
  0x9a   :  { %160 = vst [vmem:[#allocation11] sm:$0xff] %v122_v30  ;;  %v123_v31 = vsub.f32 %v81_v1, %v122_v30 }
  0x9b   :  { %185 = dma.vmem_to_hbm [thread:$0]  %s181_s20, 128, %s183_s23, [#allocation12]  }
  0x9c   :  { %156 = vmatmul.f32.vlgmr.msra.gmra.mxu1 %v123_v31 }
 0x119   :  { %v157_v32 = vpop.f32.mrf.mxu1 }
 0x11a   :  { %161 = vst [vmem:[#allocation13] sm:$0xff] %v157_v32  ;;  %v162_v33 = vsub.f32 %v123_v31, %v157_v32 }
 0x11b   :  { %196 = dma.vmem_to_hbm [thread:$0]  %s192_s25, 128, %s194_s28, [#allocation12]  }
 0x11c   :  { %163 = vst [vmem:[#allocation10] sm:$0xff] %v162_v33 }
 0x11d   :  { %174 = dma.vmem_to_hbm [thread:$0]  %s170_s30, 128, %s172_s9, [#allocation4]  }
 0x11e   :  { %402 = dma.done.wait [#allocation4], 128  }
 0x11f   :  { %403 = vsyncadd [#allocation4], 4294967168 }
 0x120   :  { %404 = dma.done.wait [#allocation12], 256  }
 0x121   :  { %405 = vsyncadd [#allocation12], 4294967040 }
 0x122   :  { %209 = vsyncpa [#allocation3], 1 }
 0x123   :  { %210 = vsyncpa [#allocation6], 1 }
 0x124   :  { %211 = vsyncpa [#allocation9], 1 }
 0x125   :  { %212 = vsyncpa [#allocation4], 1 }
 0x126   :  { %213 = vsyncpa [#allocation12], 1 }

</bundles_post_ra>
